<compile_context>
chip_gen: v7x
topology: tpu7x:2x2x1
jax: 0.10.0
libtpu: 0.0.40
codegen_flags: <defaults>
</compile_context>

<pallas_src>
import jax
import jax.numpy as jnp
from jax.experimental import pallas as pl
from jax.experimental.pallas import tpu as pltpu

_LANE = 128


def _cdiv(a: int, b: int) -> int:
    return -(-a // b)


def _sublane_min(dtype) -> int:
    # Minimum sublane granularity per packed dtype: (8,128) f32, (16,128) bf16,
    # (32,128) int8/fp8.
    return {4: 8, 2: 16, 1: 32}.get(jnp.dtype(dtype).itemsize, 8)


def _device_plan():
    """Return (block_bytes, min_grid) tuned per TPU generation."""
    try:
        kind = jax.devices()[0].device_kind.lower()
    except Exception:
        kind = ""
    if "v7" in kind or "7x" in kind:
        # 4 buffers x 6 MiB = 24 MiB: inside v7x's 32 MiB scoped default
        # (64 MiB physical). min_grid=2 shards the parallel axis over both TCs.
        return 6 * 1024 * 1024, 2
    if "v6" in kind:
        # 4 x 4 MiB = 16 MiB: inside v6e's 32 MiB scoped default.
        return 4 * 1024 * 1024, 1
    # v5e (and unknown): 4 x 2 MiB = 8 MiB, inside the 16 MiB scoped default.
    return 2 * 1024 * 1024, 1


def _copy_kernel(x_ref, o_ref):
    # Identity copy of the current (block_rows, W) tile.
    o_ref[...] = x_ref[...]


def _plan_tiling(n: int, dtype, block_bytes: int, min_grid: int):
    """Return (rows, W, block_rows) for the Pallas copy, or None to fall back
    to the metadata-only jnp.reshape path (no pad / no slice is ever emitted)."""
    itemsize = jnp.dtype(dtype).itemsize
    if itemsize not in (1, 2, 4):
        return None
    if n == 0 or n % _LANE != 0:
        return None
    sub = _sublane_min(dtype)

    # Lane-dense view: widest W (multiple of 128) that divides n.
    W = _LANE
    for cand in (8192, 4096, 2048, 1024, 512, 256):
        if n % cand == 0:
            W = cand
            break
    rows = n // W

    # Largest sub-aligned block_rows within the byte budget. The grid uses
    # cdiv, so rows need not be divisible: the ragged last block reads padding
    # and its out-of-bounds writes are discarded (safe for a pure copy). This
    # avoids the old degenerate tiny-block path when rows had no nice divisor.
    max_rows = max(sub, (block_bytes // (W * itemsize)) // sub * sub)
    if rows <= max_rows:
        if min_grid > 1 and rows >= min_grid * sub:
            # Split so the parallel axis has >= min_grid steps (v7x dual-TC).
            block_rows = _cdiv(_cdiv(rows, min_grid), sub) * sub
        else:
            block_rows = rows  # single full-dim block (exempt from (sub,128))
    else:
        block_rows = max_rows
    return rows, W, block_rows


def _pallas_copy_2d(x2d: jax.Array, block_rows: int) -> jax.Array:
    rows, W = x2d.shape
    itemsize = jnp.dtype(x2d.dtype).itemsize
    grid = (_cdiv(rows, block_rows),)
    block_bytes = block_rows * W * itemsize
    return pl.pallas_call(
        _copy_kernel,
        out_shape=jax.ShapeDtypeStruct((rows, W), x2d.dtype),
        grid_spec=pltpu.PrefetchScalarGridSpec(
            num_scalar_prefetch=0,
            grid=grid,
            in_specs=[pl.BlockSpec((block_rows, W), lambda i: (i, 0))],
            out_specs=pl.BlockSpec((block_rows, W), lambda i: (i, 0)),
        ),
        compiler_params=pltpu.CompilerParams(
            dimension_semantics=("parallel",),
            # in+out, double-buffered = 4 blocks; generous headroom, never
            # below the smallest (v5e) scoped default that already worked.
            vmem_limit_bytes=max(4 * block_bytes + (4 << 20), 16 << 20),
        ),
        cost_estimate=pl.CostEstimate(
            flops=0,
            transcendentals=0,
            bytes_accessed=2 * rows * W * itemsize,
        ),
    )(x2d)


def _resolve_shape(shape, numel):
    """Resolve a possible -1 wildcard like torch.reshape does."""
    shape = list(shape)
    if shape.count(-1) > 1:
        raise ValueError("only one -1 allowed in shape")
    if -1 in shape:
        known = 1
        for s in shape:
            if s != -1:
                known *= s
        idx = shape.index(-1)
        if known == 0:
            if numel != 0:
                raise ValueError(f"cannot reshape {numel} elements into {tuple(shape)}")
            shape[idx] = 0
        else:
            if numel % known != 0:
                raise ValueError(f"cannot reshape {numel} elements into {tuple(shape)}")
            shape[idx] = numel // known
    total = 1
    for s in shape:
        total *= s
    if total != numel:
        raise ValueError(f"cannot reshape array of size {numel} into shape {tuple(shape)}")
    return tuple(shape)


class Reshape:
    """JAX/Pallas equivalent of the PyTorch Reshape module.

    Default (materialize=False): metadata-only jnp.reshape — zero HBM traffic,
    the roofline optimum for a reshape. materialize=True forces a single-pass
    Pallas HBM->HBM copy into a fresh buffer (falls back to the metadata-only
    path when the element count doesn't view as a lane-dense 2-D slab).
    """

    def __init__(self, *args, materialize: bool = False,
                 _block_bytes: int | None = None, _min_grid: int | None = None):
        self.shape = args
        self.materialize = materialize
        self._block_bytes = _block_bytes  # test/override hooks
        self._min_grid = _min_grid

    def __call__(self, x: jax.Array) -> jax.Array:
        target = _resolve_shape(self.shape, x.size)
        if not self.materialize:
            return jnp.reshape(x, target)

        dev_block_bytes, dev_min_grid = _device_plan()
        block_bytes = self._block_bytes or dev_block_bytes
        min_grid = self._min_grid or dev_min_grid
        plan = _plan_tiling(int(x.size), x.dtype, block_bytes, min_grid)
        if plan is None:
            # Ragged / tiny / exotic-dtype sizes: reshape is metadata-only
            # anyway, so emit zero extra HBM traffic instead of pad+slice.
            return jnp.reshape(x, target)

        rows, W, block_rows = plan
        x2d = x.reshape(rows, W)            # metadata-only, row-major (= torch)
        out2d = _pallas_copy_2d(x2d, block_rows)
        return out2d.reshape(target)        # metadata-only


if __name__ == "__main__":
    key = jax.random.PRNGKey(0)

    # Primary case (matches gcn_net_batch usage): flatten spatial dims of NCHW.
    x = jax.random.normal(key, (2, 4, 16, 16), dtype=jnp.float32)
    ref = jnp.reshape(x, (2, 4, 256))

    # Default path: metadata-only (roofline optimum, no kernel).
    y0 = jax.block_until_ready(Reshape(2, 4, -1)(x))
    assert y0.shape == ref.shape and y0.dtype == ref.dtype
    assert bool(jnp.all(y0 == ref)), "metadata-only reshape mismatch"

    # Explicit materialized copy: exercises the Pallas kernel.
    y = jax.block_until_ready(Reshape(2, 4, -1, materialize=True)(x))
    assert y.shape == ref.shape and y.dtype == ref.dtype
    assert bool(jnp.all(y == ref)), "f32 Pallas reshape mismatch"

    # Sub-32-bit dtype path: dtype-aware (16,128) sublane tiling for bf16.
    xb = x.astype(jnp.bfloat16)
    refb = jnp.reshape(xb, (64, 32))
    yb = jax.block_until_ready(Reshape(-1, 32, materialize=True)(xb))
    assert yb.shape == refb.shape and yb.dtype == refb.dtype
    assert bool(jnp.all(yb == refb)), "bf16 Pallas reshape mismatch"

    # Multi-block cdiv grid with a ragged last block (forced small blocks so
    # the non-divisible-grid path is exercised at small shapes).
    xm = jax.random.normal(key, (3, 17, 128), dtype=jnp.float32)  # rows=51, W=128
    refm = jnp.reshape(xm, (17, 384))
    ym = jax.block_until_ready(
        Reshape(17, -1, materialize=True, _block_bytes=8 * 1024, _min_grid=1)(xm))
    assert ym.shape == refm.shape and ym.dtype == refm.dtype
    assert bool(jnp.all(ym == refm)), "ragged-grid Pallas reshape mismatch"

    # Ragged element count (n % 128 != 0): metadata-only fallback (no pad/slice).
    xr = jax.random.normal(key, (3, 5, 7), dtype=jnp.float32)
    yr = jax.block_until_ready(Reshape(7, -1, materialize=True)(xr))
    assert yr.shape == (7, 15)
    assert bool(jnp.all(yr == jnp.reshape(xr, (7, 15)))), "fallback reshape mismatch"

    print("KERNEL_OK")
</pallas_src>

<mosaic_0001>
module attributes {stable_mosaic.version = 11 : i64} {
  func.func @_copy_kernel(%arg0: i32, %arg1: memref<1x2048xf32, #tpu.memory_space<vmem>>, %arg2: memref<1x2048xf32, #tpu.memory_space<vmem>>) attributes {dimension_semantics = [#tpu.dimension_semantics<parallel>], iteration_bounds = array<i64: 1>, scalar_prefetch = 0 : i64, scratch_operands = 0 : i64, tpu.core_type = #tpu.core_type<tc>, window_params = [{transform_indices = @transform_0, window_bounds = array<i64: 1, 2048>}, {transform_indices = @transform_1, window_bounds = array<i64: 1, 2048>}]} {
    %c0 = arith.constant 0 : index
    %c0_0 = arith.constant 0 : index
    %0 = vector.load %arg1[%c0, %c0_0] : memref<1x2048xf32, #tpu.memory_space<vmem>>, vector<1x2048xf32>
    %c0_1 = arith.constant 0 : index
    %c0_2 = arith.constant 0 : index
    %1 = vector.load %arg2[%c0_1, %c0_2] : memref<1x2048xf32, #tpu.memory_space<vmem>>, vector<1x2048xf32>
    tpu.vector_store %arg2[%c0_1, %c0_2], %0 {strides = array<i32>} : memref<1x2048xf32, #tpu.memory_space<vmem>>, vector<1x2048xf32>,
    return
  }
  func.func @transform_0(%arg0: i32) -> (i32, i32) {
    %c0_i32 = arith.constant 0 : i32
    %c0_i32_0 = arith.constant 0 : i32
    return %arg0, %c0_i32 : i32, i32
  }
  func.func @transform_1(%arg0: i32) -> (i32, i32) {
    %c0_i32 = arith.constant 0 : i32
    %c0_i32_0 = arith.constant 0 : i32
    return %arg0, %c0_i32 : i32, i32
  }
}

</mosaic_0001>

<bundles_post_ra>
// kernel: tpu_custom_call.1
= control target key start
LH: loop header
LB: loop body
LE: loop exit
PB: predicated region body
PF: predicated region fallthrough
CT: control target
= control target key end

     0   :  { %6 = vsyncpa [#allocation3], 0  ;;  %s126_s0 = inlined_call_operand.hbm [shape: f32[1,2048], index: 0, kind: input, shape index: {}]   ;;  %s127_s1 = inlined_call_operand.hbm [shape: f32[1,2048], index: 1, kind: output, shape index: {}]  }
   0x1   :  { %7 = vsyncpa [#allocation4], 0  ;;  %s90_s6 = smov [#allocation2]   ;;  %s42_s10 = scalar_lea.hbm %s126_s0, 256 }
   0x2   :  { %s14_s7 = sshll.u32 %s90_s6, 4  ;;  %p43_p0 = scmp.ne.s32.totalorder %s126_s0, %s42_s10  ;;  %s15_s7 = int_to_ptr.vmem [resolvable:$true] %s14_s7 }
   0x3   :  { %p46_p1 = scmp.lt.u32.totalorder %s42_s10, %s126_s0 }
   0x5   :  { %p48_p2 = pnand %p46_p1, %p43_p0 }
   0x7   :  { %51 = shalt.err (!%p48_p2)
}
   0x8   :  { %s52_s15 = scalar_lea.vmem %s15_s7, 256  ;;  %p57_p4 = scmp.lt.s32.totalorder %s15_s7, %s15_s7 }
   0x9   :  { %p53_p3 = scmp.ne.s32.totalorder %s15_s7, %s52_s15  ;;  %p58_p5 = scmp.lt.s32.totalorder %s52_s15, %s52_s15 }
   0xb   :  { %p59_p6 = por %p58_p5, %p57_p4 }
   0xd   :  { %p60_p7 = pnand %p59_p6, %p53_p3 }
   0xf   :  { %63 = shalt.err (!%p60_p7)
}
  0x10   :  { %17 = dma.hbm_to_vmem [thread:$0]  %s126_s0, 256, %s15_s7, [#allocation3]  }
  0x11   :  { %86 = dma.done.wait [#allocation3], 256  }
  0x12   :  { %87 = vsyncadd [#allocation3], 4294967040  ;;  %s91_s18 = smov [#allocation5]   ;;  %v21_v0 = vld [vmem:[#allocation2] sm:$0xff]  ;;  %v22_v1 = vld [vmem:[#allocation2 + $0x8] sm:$0xff] }
  0x13   :  { %s31_s19 = sshll.u32 %s91_s18, 4  ;;  %23 = vst [vmem:[#allocation5] sm:$0xff] %v21_v0  ;;  %24 = vst [vmem:[#allocation5 + $0x8] sm:$0xff] %v22_v1  ;;  %s32_s19 = int_to_ptr.vmem [resolvable:$true] %s31_s19 }
  0x14   :  { %s64_s20 = scalar_lea.vmem %s32_s19, 256  ;;  %p69_p9 = scmp.lt.s32.totalorder %s32_s19, %s32_s19 }
  0x15   :  { %p65_p8 = scmp.ne.s32.totalorder %s32_s19, %s64_s20  ;;  %p70_p10 = scmp.lt.s32.totalorder %s64_s20, %s64_s20 }
  0x17   :  { %p71_p11 = por %p70_p10, %p69_p9 }
  0x19   :  { %p72_p12 = pnand %p71_p11, %p65_p8 }
  0x1b   :  { %75 = shalt.err (!%p72_p12)
}
  0x1c   :  { %s76_s0 = scalar_lea.hbm %s127_s1, 256 }
  0x1d   :  { %p77_p13 = scmp.ne.s32.totalorder %s127_s1, %s76_s0  ;;  %p80_p0 = scmp.lt.u32.totalorder %s76_s0, %s127_s1 }
  0x1f   :  { %p82_p1 = pnand %p80_p0, %p77_p13 }
  0x21   :  { %85 = shalt.err (!%p82_p1)
}
  0x22   :  { %34 = dma.vmem_to_hbm [thread:$0]  %s32_s19, 256, %s127_s1, [#allocation4]  }
  0x23   :  { %88 = dma.done.wait [#allocation4], 256  }
  0x24   :  { %89 = vsyncadd [#allocation4], 4294967040 }
  0x25   :  { %38 = vsyncpa [#allocation3], 1 }
  0x26   :  { %39 = vsyncpa [#allocation4], 1 }

</bundles_post_ra>
